<compile_context>
chip_gen: v5e
topology: v5e:2x2
jax: 0.10.0
libtpu: 0.0.40
codegen_flags: <defaults>
</compile_context>

<pallas_src>
import jax
import jax.numpy as jnp
import numpy as np
from jax.experimental import pallas as pl
from jax.experimental.pallas import tpu as pltpu

# ---- model hyper-parameters (small, consistent with the module) ----
B = 2          # batch
S = 8          # sequence length
D_MODEL = 32
D_INNER = 64
N_HEAD = 4
D_K = 8
D_V = 8
TEMPERATURE = float(np.sqrt(D_K))
EPS = 1e-5

# ---- packed weight-slab layout: (_SLAB_ROWS, 128) f32 ----
# rows [0,32)   : lanes [0,96)  = [Wq*(1/T) | Wk | Wv] (head-major), lanes [96,128) = Wfc
# rows [32,96)  : lanes [0,32)  = W2 (64,32)
# rows [32,64)  : lanes [32,96) = W1 (32,64)
# rows [32,48)  : lanes [96,112)= additive block-diagonal softmax mask (16,16)
# row  96       : lanes [0,96)  = [bq*(1/T) | bk | bv], lanes [96,128) = bfc
# row  97       : lanes [0,64)  = bw1, lanes [64,96) = bw2
# row  98       : lanes: [0,32)=g1, [32,64)=be1, [64,96)=g2, [96,128)=be2
# rows [99,104) : zero pad (rows padded to a multiple of 8)
_R_W2 = 32
_R_W1 = 32
_R_MASK = 32
_R_BQKV = 96
_R_BFFN = 97
_R_LN = 98
_SLAB_ROWS = 104


def _layer_norm(y, gamma, beta):
    mu = jnp.mean(y, axis=-1, keepdims=True)
    var = jnp.mean((y - mu) ** 2, axis=-1, keepdims=True)
    return (y - mu) * jax.lax.rsqrt(var + EPS) * gamma + beta


def encoder_layer_kernel(x_ref, w_ref, out_ref):
    # x_ref   : (B*S, D_MODEL)      folded batch, lane-dense
    # w_ref   : (_SLAB_ROWS, 128)   packed parameters + mask (see layout above)
    # out_ref : (B*S, 128)          lanes [0,32)=enc_output, [32,96)=attn, [96,128)=0
    x = x_ref[...]                                                    # (16, 32)

    # --- fused QKV projection: one full-lane-width MXU matmul + one bias-row add.
    # lanes [0,96) of the result are q|k|v (1/temperature pre-folded into q);
    # lanes [96,128) are x@Wfc junk that is never read.
    qkv = (jnp.dot(x, w_ref[0:D_MODEL, :], preferred_element_type=jnp.float32)
           + w_ref[_R_BQKV:_R_BQKV + 1, :])                           # (16, 128)

    # precomputed additive mask: 0 inside a batch's own block, -1e30 across batches,
    # so the softmax over folded (B*S) keys is exactly per-batch.
    mask_add = w_ref[_R_MASK:_R_MASK + B * S, 96:96 + B * S]          # (16, 16)

    attn_tiles = []
    head_outs = []
    for h in range(N_HEAD):  # static unroll: N_HEAD is a small compile-time constant
        q_h = qkv[:, h * D_K:(h + 1) * D_K]                           # (16, 8)
        k_h = qkv[:, 32 + h * D_K:32 + (h + 1) * D_K]                 # (16, 8)
        v_h = qkv[:, 64 + h * D_V:64 + (h + 1) * D_V]                 # (16, 8)

        # scores over folded batch; contraction on last dims (no k_h.T materialized)
        s = jax.lax.dot_general(q_h, k_h, (((1,), (1,)), ((), ())),
                                preferred_element_type=jnp.float32)   # (16, 16)
        s = s + mask_add

        m = jnp.max(s, axis=-1, keepdims=True)
        e = jnp.exp(s - m)
        denom = jnp.sum(e, axis=-1, keepdims=True)
        # approx=False keeps the tight 2e-5 check; 4 tiny reciprocals are negligible.
        attn = e * pl.reciprocal(denom, approx=False)                 # (16, 16)
        attn_tiles.append(attn)
        head_outs.append(jnp.dot(attn, v_h,
                                 preferred_element_type=jnp.float32))  # (16, 8)

    # lane-dense head concat -> single MXU matmul against Wfc
    concat_heads = jnp.concatenate(head_outs, axis=1)                 # (16, 32)
    wfc = w_ref[0:D_MODEL, 96:128]                                    # (32, 32)
    bfc = w_ref[_R_BQKV:_R_BQKV + 1, 96:128]
    proj = jnp.dot(concat_heads, wfc, preferred_element_type=jnp.float32) + bfc

    # dropout (eval) = identity; residual + layer norm 1
    g1 = w_ref[_R_LN:_R_LN + 1, 0:32]
    be1 = w_ref[_R_LN:_R_LN + 1, 32:64]
    y = _layer_norm(proj + x, g1, be1)

    # --- position-wise feed-forward (Conv1d k=1 == linear) ---
    w1 = w_ref[_R_W1:_R_W1 + D_MODEL, 32:32 + D_INNER]                # (32, 64)
    bw1 = w_ref[_R_BFFN:_R_BFFN + 1, 0:D_INNER]
    h1 = jnp.maximum(jnp.dot(y, w1, preferred_element_type=jnp.float32) + bw1, 0.0)

    w2 = w_ref[_R_W2:_R_W2 + D_INNER, 0:D_MODEL]                      # (64, 32)
    bw2 = w_ref[_R_BFFN:_R_BFFN + 1, 64:96]
    h2 = jnp.dot(h1, w2, preferred_element_type=jnp.float32) + bw2

    g2 = w_ref[_R_LN:_R_LN + 1, 64:96]
    be2 = w_ref[_R_LN:_R_LN + 1, 96:128]
    out_block = _layer_norm(h2 + y, g2, be2)                          # (16, 32)

    # single unmasked full-width store: [enc_output | attn (4 heads) | zero pad]
    out_ref[...] = jnp.concatenate(
        [out_block] + attn_tiles + [jnp.zeros((B * S, 32), jnp.float32)], axis=1)


def pack_params(params):
    """Pack the 16 parameter tensors + softmax mask into one 128-lane slab (host side)."""
    (wq, bq, wk, bk, wv, bv, wfc, bfc, g1, be1, w1, bw1, w2, bw2, g2, be2) = params
    inv_t = np.float32(1.0 / TEMPERATURE)

    slab = jnp.zeros((_SLAB_ROWS, 128), jnp.float32)
    # fused QKV weights (1/temperature folded into the Q columns) + fc weight
    slab = slab.at[0:D_MODEL, 0:32].set(wq * inv_t)
    slab = slab.at[0:D_MODEL, 32:64].set(wk)
    slab = slab.at[0:D_MODEL, 64:96].set(wv)
    slab = slab.at[0:D_MODEL, 96:128].set(wfc)
    # FFN weights
    slab = slab.at[_R_W2:_R_W2 + D_INNER, 0:D_MODEL].set(w2)
    slab = slab.at[_R_W1:_R_W1 + D_MODEL, 32:32 + D_INNER].set(w1)
    # precomputed block-diagonal additive mask (per-batch softmax on folded rows)
    rows_i = np.arange(B * S)[:, None] // S
    cols_i = np.arange(B * S)[None, :] // S
    mask_add = np.where(rows_i == cols_i, 0.0, -1e30).astype(np.float32)
    slab = slab.at[_R_MASK:_R_MASK + B * S, 96:96 + B * S].set(jnp.asarray(mask_add))
    # bias / LayerNorm rows
    slab = slab.at[_R_BQKV, 0:32].set((bq * inv_t)[0])
    slab = slab.at[_R_BQKV, 32:64].set(bk[0])
    slab = slab.at[_R_BQKV, 64:96].set(bv[0])
    slab = slab.at[_R_BQKV, 96:128].set(bfc[0])
    slab = slab.at[_R_BFFN, 0:D_INNER].set(bw1[0])
    slab = slab.at[_R_BFFN, 64:96].set(bw2[0])
    slab = slab.at[_R_LN, 0:32].set(g1[0])
    slab = slab.at[_R_LN, 32:64].set(be1[0])
    slab = slab.at[_R_LN, 64:96].set(g2[0])
    slab = slab.at[_R_LN, 96:128].set(be2[0])
    return slab


@jax.jit
def encoder_layer(x, slab):
    x2d = x.reshape(B * S, D_MODEL)

    res = pl.pallas_call(
        encoder_layer_kernel,
        out_shape=jax.ShapeDtypeStruct((B * S, 128), jnp.float32),
        # no grid: whole arrays resident in VMEM, no pointless double-buffering
        in_specs=[
            pl.BlockSpec(memory_space=pltpu.MemorySpace.VMEM),
            pl.BlockSpec(memory_space=pltpu.MemorySpace.VMEM),
        ],
        out_specs=pl.BlockSpec(memory_space=pltpu.MemorySpace.VMEM),
    )(x2d, slab)

    out = res[:, 0:D_MODEL].reshape(B, S, D_MODEL)

    # attn lanes: res[b*S+q, D_MODEL + h*(B*S) + b2*S + k]; keep the b2 == b diagonal
    # blocks, head-major, matching PyTorch's (n_head * sz_b, len_q, len_k) layout.
    attn2d = res[:, D_MODEL:D_MODEL + N_HEAD * B * S]
    a = attn2d.reshape(B, S, N_HEAD, B, S)
    idx = jnp.arange(B)
    a = a[idx, :, :, idx, :]                        # (B, S, N_HEAD, S)
    attn = a.transpose(2, 0, 1, 3).reshape(N_HEAD * B, S, S)
    return out, attn


def make_params(key):
    ks = jax.random.split(key, 8)
    std_qk = np.sqrt(2.0 / (D_MODEL + D_K))
    std_v = np.sqrt(2.0 / (D_MODEL + D_V))
    # weights stored in (in, out) layout (== W.T of torch nn.Linear / squeezed Conv1d)
    wq = std_qk * jax.random.normal(ks[0], (D_MODEL, N_HEAD * D_K), jnp.float32)
    wk = std_qk * jax.random.normal(ks[1], (D_MODEL, N_HEAD * D_K), jnp.float32)
    wv = std_v * jax.random.normal(ks[2], (D_MODEL, N_HEAD * D_V), jnp.float32)
    wfc = (np.sqrt(2.0 / (N_HEAD * D_V + D_MODEL))
           * jax.random.normal(ks[3], (N_HEAD * D_V, D_MODEL), jnp.float32))
    w1 = 0.1 * jax.random.normal(ks[4], (D_MODEL, D_INNER), jnp.float32)
    w2 = 0.1 * jax.random.normal(ks[5], (D_INNER, D_MODEL), jnp.float32)
    bq = 0.01 * jax.random.normal(ks[6], (1, N_HEAD * D_K), jnp.float32)
    bk = jnp.zeros((1, N_HEAD * D_K), jnp.float32)
    bv = jnp.zeros((1, N_HEAD * D_V), jnp.float32)
    bfc = 0.01 * jax.random.normal(ks[7], (1, D_MODEL), jnp.float32)
    bw1 = jnp.zeros((1, D_INNER), jnp.float32)
    bw2 = jnp.zeros((1, D_MODEL), jnp.float32)
    # LayerNorm affine params (torch default init: ones / zeros)
    g1 = jnp.ones((1, D_MODEL), jnp.float32)
    be1 = jnp.zeros((1, D_MODEL), jnp.float32)
    g2 = jnp.ones((1, D_MODEL), jnp.float32)
    be2 = jnp.zeros((1, D_MODEL), jnp.float32)
    return (wq, bq, wk, bk, wv, bv, wfc, bfc, g1, be1, w1, bw1, w2, bw2, g2, be2)


def reference(x, params):
    """Pure-JAX reference mirroring the PyTorch forward (eval mode, no masks)."""
    (wq, bq, wk, bk, wv, bv, wfc, bfc, g1, be1, w1, bw1, w2, bw2, g2, be2) = params
    q = (x @ wq + bq).reshape(B, S, N_HEAD, D_K).transpose(2, 0, 1, 3)
    k = (x @ wk + bk).reshape(B, S, N_HEAD, D_K).transpose(2, 0, 1, 3)
    v = (x @ wv + bv).reshape(B, S, N_HEAD, D_V).transpose(2, 0, 1, 3)
    scores = jnp.einsum("hbqd,hbkd->hbqk", q, k) / TEMPERATURE
    attn = jax.nn.softmax(scores, axis=-1)
    out = jnp.einsum("hbqk,hbkd->hbqd", attn, v)          # (H,B,S,D_V)
    out = out.transpose(1, 2, 0, 3).reshape(B, S, N_HEAD * D_V)
    y = _layer_norm(out @ wfc + bfc + x, g1, be1)
    h1 = jnp.maximum(y @ w1 + bw1, 0.0)
    z = _layer_norm(h1 @ w2 + bw2 + y, g2, be2)
    return z, attn.reshape(N_HEAD * B, S, S)


if __name__ == "__main__":
    key = jax.random.PRNGKey(0)
    kx, kp = jax.random.split(key)
    x = jax.random.normal(kx, (B, S, D_MODEL), jnp.float32)
    params = make_params(kp)
    slab = pack_params(params)   # host-side packing, done once

    out, attn = encoder_layer(x, slab)
    out = jax.block_until_ready(out)
    attn = jax.block_until_ready(attn)

    ref_out, ref_attn = reference(x, params)
    assert np.allclose(np.asarray(out), np.asarray(ref_out), atol=2e-5, rtol=2e-5)
    assert np.allclose(np.asarray(attn), np.asarray(ref_attn), atol=2e-5, rtol=2e-5)
    print("KERNEL_OK")
</pallas_src>

<mosaic_0001>
module attributes {stable_mosaic.version = 11 : i64} {
  func.func @encoder_layer_kernel(%arg0: memref<16x32xf32, #tpu.memory_space<vmem>>, %arg1: memref<104x128xf32, #tpu.memory_space<vmem>>, %arg2: memref<16x128xf32, #tpu.memory_space<vmem>>) attributes {dimension_semantics = [], scalar_prefetch = 0 : i64, scratch_operands = 0 : i64, tpu.core_type = #tpu.core_type<tc>} {
    %c0 = arith.constant 0 : index
    %c0_0 = arith.constant 0 : index
    %0 = vector.load %arg0[%c0, %c0_0] : memref<16x32xf32, #tpu.memory_space<vmem>>, vector<16x32xf32>
    %c0_1 = arith.constant 0 : index
    %c0_2 = arith.constant 0 : index
    %1 = vector.load %arg1[%c0_1, %c0_2] : memref<104x128xf32, #tpu.memory_space<vmem>>, vector<32x128xf32>
    %cst = arith.constant dense<0.000000e+00> : vector<16x128xf32>
    %2 = tpu.matmul %0, %1, %cst {dimension_numbers = #tpu.dot_dimension_numbers<[1], [0], [0], [1], [0, 0, 1, 1], [], []>} : vector<16x32xf32>, vector<32x128xf32>, vector<16x128xf32> -> vector<16x128xf32>
    %c96 = arith.constant 96 : index
    %c0_3 = arith.constant 0 : index
    %3 = vector.load %arg1[%c96, %c0_3] : memref<104x128xf32, #tpu.memory_space<vmem>>, vector<1x128xf32>
    %4 = vector.broadcast %3 : vector<1x128xf32> to vector<16x128xf32>
    %5 = arith.addf %2, %4 : vector<16x128xf32>
    %c32 = arith.constant 32 : index
    %c96_4 = arith.constant 96 : index
    %6 = vector.load %arg1[%c32, %c96_4] : memref<104x128xf32, #tpu.memory_space<vmem>>, vector<16x16xf32>
    %7 = vector.extract_strided_slice %5 {offsets = [0, 0], sizes = [16, 8], strides = [1, 1]} : vector<16x128xf32> to vector<16x8xf32>
    %8 = vector.extract_strided_slice %5 {offsets = [0, 32], sizes = [16, 8], strides = [1, 1]} : vector<16x128xf32> to vector<16x8xf32>
    %9 = vector.extract_strided_slice %5 {offsets = [0, 64], sizes = [16, 8], strides = [1, 1]} : vector<16x128xf32> to vector<16x8xf32>
    %cst_5 = arith.constant dense<0.000000e+00> : vector<16x16xf32>
    %10 = tpu.matmul %7, %8, %cst_5 {dimension_numbers = #tpu.dot_dimension_numbers<[1], [1], [0], [0], [0, 0, 1, 0], [], []>} : vector<16x8xf32>, vector<16x8xf32>, vector<16x16xf32> -> vector<16x16xf32>
    %11 = arith.addf %10, %6 : vector<16x16xf32>
    %cst_6 = arith.constant dense<0xFF800000> : vector<16xf32>
    %12 = vector.multi_reduction <maximumf>, %11, %cst_6 [1] : vector<16x16xf32> to vector<16xf32>
    %13 = vector.shape_cast %12 : vector<16xf32> to vector<16x1xf32>
    %14 = vector.broadcast %13 : vector<16x1xf32> to vector<16x16xf32>
    %15 = arith.subf %11, %14 : vector<16x16xf32>
    %16 = math.exp %15 : vector<16x16xf32>
    %cst_7 = arith.constant dense<0.000000e+00> : vector<16xf32>
    %17 = vector.multi_reduction <add>, %16, %cst_7 [1] : vector<16x16xf32> to vector<16xf32>
    %18 = vector.shape_cast %17 : vector<16xf32> to vector<16x1xf32>
    %19 = tpu.reciprocal %18 : vector<16x1xf32> -> vector<16x1xf32>
    %20 = vector.broadcast %19 : vector<16x1xf32> to vector<16x16xf32>
    %21 = arith.mulf %16, %20 : vector<16x16xf32>
    %cst_8 = arith.constant dense<0.000000e+00> : vector<16x8xf32>
    %22 = tpu.matmul %21, %9, %cst_8 {dimension_numbers = #tpu.dot_dimension_numbers<[1], [0], [0], [1], [0, 0, 1, 1], [], []>} : vector<16x16xf32>, vector<16x8xf32>, vector<16x8xf32> -> vector<16x8xf32>
    %23 = vector.extract_strided_slice %5 {offsets = [0, 8], sizes = [16, 8], strides = [1, 1]} : vector<16x128xf32> to vector<16x8xf32>
    %24 = vector.extract_strided_slice %5 {offsets = [0, 40], sizes = [16, 8], strides = [1, 1]} : vector<16x128xf32> to vector<16x8xf32>
    %25 = vector.extract_strided_slice %5 {offsets = [0, 72], sizes = [16, 8], strides = [1, 1]} : vector<16x128xf32> to vector<16x8xf32>
    %cst_9 = arith.constant dense<0.000000e+00> : vector<16x16xf32>
    %26 = tpu.matmul %23, %24, %cst_9 {dimension_numbers = #tpu.dot_dimension_numbers<[1], [1], [0], [0], [0, 0, 1, 0], [], []>} : vector<16x8xf32>, vector<16x8xf32>, vector<16x16xf32> -> vector<16x16xf32>
    %27 = arith.addf %26, %6 : vector<16x16xf32>
    %cst_10 = arith.constant dense<0xFF800000> : vector<16xf32>
    %28 = vector.multi_reduction <maximumf>, %27, %cst_10 [1] : vector<16x16xf32> to vector<16xf32>
    %29 = vector.shape_cast %28 : vector<16xf32> to vector<16x1xf32>
    %30 = vector.broadcast %29 : vector<16x1xf32> to vector<16x16xf32>
    %31 = arith.subf %27, %30 : vector<16x16xf32>
    %32 = math.exp %31 : vector<16x16xf32>
    %cst_11 = arith.constant dense<0.000000e+00> : vector<16xf32>
    %33 = vector.multi_reduction <add>, %32, %cst_11 [1] : vector<16x16xf32> to vector<16xf32>
    %34 = vector.shape_cast %33 : vector<16xf32> to vector<16x1xf32>
    %35 = tpu.reciprocal %34 : vector<16x1xf32> -> vector<16x1xf32>
    %36 = vector.broadcast %35 : vector<16x1xf32> to vector<16x16xf32>
    %37 = arith.mulf %32, %36 : vector<16x16xf32>
    %cst_12 = arith.constant dense<0.000000e+00> : vector<16x8xf32>
    %38 = tpu.matmul %37, %25, %cst_12 {dimension_numbers = #tpu.dot_dimension_numbers<[1], [0], [0], [1], [0, 0, 1, 1], [], []>} : vector<16x16xf32>, vector<16x8xf32>, vector<16x8xf32> -> vector<16x8xf32>
    %39 = vector.extract_strided_slice %5 {offsets = [0, 16], sizes = [16, 8], strides = [1, 1]} : vector<16x128xf32> to vector<16x8xf32>
    %40 = vector.extract_strided_slice %5 {offsets = [0, 48], sizes = [16, 8], strides = [1, 1]} : vector<16x128xf32> to vector<16x8xf32>
    %41 = vector.extract_strided_slice %5 {offsets = [0, 80], sizes = [16, 8], strides = [1, 1]} : vector<16x128xf32> to vector<16x8xf32>
    %cst_13 = arith.constant dense<0.000000e+00> : vector<16x16xf32>
    %42 = tpu.matmul %39, %40, %cst_13 {dimension_numbers = #tpu.dot_dimension_numbers<[1], [1], [0], [0], [0, 0, 1, 0], [], []>} : vector<16x8xf32>, vector<16x8xf32>, vector<16x16xf32> -> vector<16x16xf32>
    %43 = arith.addf %42, %6 : vector<16x16xf32>
    %cst_14 = arith.constant dense<0xFF800000> : vector<16xf32>
    %44 = vector.multi_reduction <maximumf>, %43, %cst_14 [1] : vector<16x16xf32> to vector<16xf32>
    %45 = vector.shape_cast %44 : vector<16xf32> to vector<16x1xf32>
    %46 = vector.broadcast %45 : vector<16x1xf32> to vector<16x16xf32>
    %47 = arith.subf %43, %46 : vector<16x16xf32>
    %48 = math.exp %47 : vector<16x16xf32>
    %cst_15 = arith.constant dense<0.000000e+00> : vector<16xf32>
    %49 = vector.multi_reduction <add>, %48, %cst_15 [1] : vector<16x16xf32> to vector<16xf32>
    %50 = vector.shape_cast %49 : vector<16xf32> to vector<16x1xf32>
    %51 = tpu.reciprocal %50 : vector<16x1xf32> -> vector<16x1xf32>
    %52 = vector.broadcast %51 : vector<16x1xf32> to vector<16x16xf32>
    %53 = arith.mulf %48, %52 : vector<16x16xf32>
    %cst_16 = arith.constant dense<0.000000e+00> : vector<16x8xf32>
    %54 = tpu.matmul %53, %41, %cst_16 {dimension_numbers = #tpu.dot_dimension_numbers<[1], [0], [0], [1], [0, 0, 1, 1], [], []>} : vector<16x16xf32>, vector<16x8xf32>, vector<16x8xf32> -> vector<16x8xf32>
    %55 = vector.extract_strided_slice %5 {offsets = [0, 24], sizes = [16, 8], strides = [1, 1]} : vector<16x128xf32> to vector<16x8xf32>
    %56 = vector.extract_strided_slice %5 {offsets = [0, 56], sizes = [16, 8], strides = [1, 1]} : vector<16x128xf32> to vector<16x8xf32>
    %57 = vector.extract_strided_slice %5 {offsets = [0, 88], sizes = [16, 8], strides = [1, 1]} : vector<16x128xf32> to vector<16x8xf32>
    %cst_17 = arith.constant dense<0.000000e+00> : vector<16x16xf32>
    %58 = tpu.matmul %55, %56, %cst_17 {dimension_numbers = #tpu.dot_dimension_numbers<[1], [1], [0], [0], [0, 0, 1, 0], [], []>} : vector<16x8xf32>, vector<16x8xf32>, vector<16x16xf32> -> vector<16x16xf32>
    %59 = arith.addf %58, %6 : vector<16x16xf32>
    %cst_18 = arith.constant dense<0xFF800000> : vector<16xf32>
    %60 = vector.multi_reduction <maximumf>, %59, %cst_18 [1] : vector<16x16xf32> to vector<16xf32>
    %61 = vector.shape_cast %60 : vector<16xf32> to vector<16x1xf32>
    %62 = vector.broadcast %61 : vector<16x1xf32> to vector<16x16xf32>
    %63 = arith.subf %59, %62 : vector<16x16xf32>
    %64 = math.exp %63 : vector<16x16xf32>
    %cst_19 = arith.constant dense<0.000000e+00> : vector<16xf32>
    %65 = vector.multi_reduction <add>, %64, %cst_19 [1] : vector<16x16xf32> to vector<16xf32>
    %66 = vector.shape_cast %65 : vector<16xf32> to vector<16x1xf32>
    %67 = tpu.reciprocal %66 : vector<16x1xf32> -> vector<16x1xf32>
    %68 = vector.broadcast %67 : vector<16x1xf32> to vector<16x16xf32>
    %69 = arith.mulf %64, %68 : vector<16x16xf32>
    %cst_20 = arith.constant dense<0.000000e+00> : vector<16x8xf32>
    %70 = tpu.matmul %69, %57, %cst_20 {dimension_numbers = #tpu.dot_dimension_numbers<[1], [0], [0], [1], [0, 0, 1, 1], [], []>} : vector<16x16xf32>, vector<16x8xf32>, vector<16x8xf32> -> vector<16x8xf32>
    %71 = tpu.concatenate %22, %38, %54, %70 in 1 : vector<16x8xf32>, vector<16x8xf32>, vector<16x8xf32>, vector<16x8xf32> -> vector<16x32xf32>
    %c0_21 = arith.constant 0 : index
    %c96_22 = arith.constant 96 : index
    %72 = vector.load %arg1[%c0_21, %c96_22] : memref<104x128xf32, #tpu.memory_space<vmem>>, vector<32x32xf32>
    %c96_23 = arith.constant 96 : index
    %c96_24 = arith.constant 96 : index
    %73 = vector.load %arg1[%c96_23, %c96_24] : memref<104x128xf32, #tpu.memory_space<vmem>>, vector<1x32xf32>
    %cst_25 = arith.constant dense<0.000000e+00> : vector<16x32xf32>
    %74 = tpu.matmul %71, %72, %cst_25 {dimension_numbers = #tpu.dot_dimension_numbers<[1], [0], [0], [1], [0, 0, 1, 1], [], []>} : vector<16x32xf32>, vector<32x32xf32>, vector<16x32xf32> -> vector<16x32xf32>
    %75 = vector.broadcast %73 : vector<1x32xf32> to vector<16x32xf32>
    %76 = arith.addf %74, %75 : vector<16x32xf32>
    %c98 = arith.constant 98 : index
    %c0_26 = arith.constant 0 : index
    %77 = vector.load %arg1[%c98, %c0_26] : memref<104x128xf32, #tpu.memory_space<vmem>>, vector<1x32xf32>
    %c98_27 = arith.constant 98 : index
    %c32_28 = arith.constant 32 : index
    %78 = vector.load %arg1[%c98_27, %c32_28] : memref<104x128xf32, #tpu.memory_space<vmem>>, vector<1x32xf32>
    %79 = arith.addf %76, %0 : vector<16x32xf32>
    %cst_29 = arith.constant dense<0.000000e+00> : vector<16xf32>
    %80 = vector.multi_reduction <add>, %79, %cst_29 [1] : vector<16x32xf32> to vector<16xf32>
    %81 = vector.shape_cast %80 : vector<16xf32> to vector<16x1xf32>
    %cst_30 = arith.constant 3.200000e+01 : f32
    %82 = vector.broadcast %cst_30 : f32 to vector<16x1xf32>
    %83 = arith.divf %81, %82 : vector<16x1xf32>
    %84 = vector.broadcast %83 : vector<16x1xf32> to vector<16x32xf32>
    %85 = arith.subf %79, %84 : vector<16x32xf32>
    %86 = arith.mulf %85, %85 : vector<16x32xf32>
    %cst_31 = arith.constant dense<0.000000e+00> : vector<16xf32>
    %87 = vector.multi_reduction <add>, %86, %cst_31 [1] : vector<16x32xf32> to vector<16xf32>
    %88 = vector.shape_cast %87 : vector<16xf32> to vector<16x1xf32>
    %cst_32 = arith.constant 3.200000e+01 : f32
    %89 = vector.broadcast %cst_32 : f32 to vector<16x1xf32>
    %90 = arith.divf %88, %89 : vector<16x1xf32>
    %91 = vector.broadcast %83 : vector<16x1xf32> to vector<16x32xf32>
    %92 = arith.subf %79, %91 : vector<16x32xf32>
    %cst_33 = arith.constant 9.99999974E-6 : f32
    %93 = vector.broadcast %cst_33 : f32 to vector<16x1xf32>
    %94 = arith.addf %90, %93 : vector<16x1xf32>
    %95 = math.rsqrt %94 : vector<16x1xf32>
    %96 = vector.broadcast %95 : vector<16x1xf32> to vector<16x32xf32>
    %97 = arith.mulf %92, %96 : vector<16x32xf32>
    %98 = vector.broadcast %77 : vector<1x32xf32> to vector<16x32xf32>
    %99 = arith.mulf %97, %98 : vector<16x32xf32>
    %100 = vector.broadcast %78 : vector<1x32xf32> to vector<16x32xf32>
    %101 = arith.addf %99, %100 : vector<16x32xf32>
    %c32_34 = arith.constant 32 : index
    %c32_35 = arith.constant 32 : index
    %102 = vector.load %arg1[%c32_34, %c32_35] : memref<104x128xf32, #tpu.memory_space<vmem>>, vector<32x64xf32>
    %c97 = arith.constant 97 : index
    %c0_36 = arith.constant 0 : index
    %103 = vector.load %arg1[%c97, %c0_36] : memref<104x128xf32, #tpu.memory_space<vmem>>, vector<1x64xf32>
    %cst_37 = arith.constant dense<0.000000e+00> : vector<16x64xf32>
    %104 = tpu.matmul %101, %102, %cst_37 {dimension_numbers = #tpu.dot_dimension_numbers<[1], [0], [0], [1], [0, 0, 1, 1], [], []>} : vector<16x32xf32>, vector<32x64xf32>, vector<16x64xf32> -> vector<16x64xf32>
    %105 = vector.broadcast %103 : vector<1x64xf32> to vector<16x64xf32>
    %106 = arith.addf %104, %105 : vector<16x64xf32>
    %cst_38 = arith.constant 0.000000e+00 : f32
    %107 = vector.broadcast %cst_38 : f32 to vector<16x64xf32>
    %108 = arith.maximumf %106, %107 : vector<16x64xf32>
    %c32_39 = arith.constant 32 : index
    %c0_40 = arith.constant 0 : index
    %109 = vector.load %arg1[%c32_39, %c0_40] : memref<104x128xf32, #tpu.memory_space<vmem>>, vector<64x32xf32>
    %c97_41 = arith.constant 97 : index
    %c64 = arith.constant 64 : index
    %110 = vector.load %arg1[%c97_41, %c64] : memref<104x128xf32, #tpu.memory_space<vmem>>, vector<1x32xf32>
    %cst_42 = arith.constant dense<0.000000e+00> : vector<16x32xf32>
    %111 = tpu.matmul %108, %109, %cst_42 {dimension_numbers = #tpu.dot_dimension_numbers<[1], [0], [0], [1], [0, 0, 1, 1], [], []>} : vector<16x64xf32>, vector<64x32xf32>, vector<16x32xf32> -> vector<16x32xf32>
    %112 = vector.broadcast %110 : vector<1x32xf32> to vector<16x32xf32>
    %113 = arith.addf %111, %112 : vector<16x32xf32>
    %c98_43 = arith.constant 98 : index
    %c64_44 = arith.constant 64 : index
    %114 = vector.load %arg1[%c98_43, %c64_44] : memref<104x128xf32, #tpu.memory_space<vmem>>, vector<1x32xf32>
    %c98_45 = arith.constant 98 : index
    %c96_46 = arith.constant 96 : index
    %115 = vector.load %arg1[%c98_45, %c96_46] : memref<104x128xf32, #tpu.memory_space<vmem>>, vector<1x32xf32>
    %116 = arith.addf %113, %101 : vector<16x32xf32>
    %cst_47 = arith.constant dense<0.000000e+00> : vector<16xf32>
    %117 = vector.multi_reduction <add>, %116, %cst_47 [1] : vector<16x32xf32> to vector<16xf32>
    %118 = vector.shape_cast %117 : vector<16xf32> to vector<16x1xf32>
    %cst_48 = arith.constant 3.200000e+01 : f32
    %119 = vector.broadcast %cst_48 : f32 to vector<16x1xf32>
    %120 = arith.divf %118, %119 : vector<16x1xf32>
    %121 = vector.broadcast %120 : vector<16x1xf32> to vector<16x32xf32>
    %122 = arith.subf %116, %121 : vector<16x32xf32>
    %123 = arith.mulf %122, %122 : vector<16x32xf32>
    %cst_49 = arith.constant dense<0.000000e+00> : vector<16xf32>
    %124 = vector.multi_reduction <add>, %123, %cst_49 [1] : vector<16x32xf32> to vector<16xf32>
    %125 = vector.shape_cast %124 : vector<16xf32> to vector<16x1xf32>
    %cst_50 = arith.constant 3.200000e+01 : f32
    %126 = vector.broadcast %cst_50 : f32 to vector<16x1xf32>
    %127 = arith.divf %125, %126 : vector<16x1xf32>
    %128 = vector.broadcast %120 : vector<16x1xf32> to vector<16x32xf32>
    %129 = arith.subf %116, %128 : vector<16x32xf32>
    %cst_51 = arith.constant 9.99999974E-6 : f32
    %130 = vector.broadcast %cst_51 : f32 to vector<16x1xf32>
    %131 = arith.addf %127, %130 : vector<16x1xf32>
    %132 = math.rsqrt %131 : vector<16x1xf32>
    %133 = vector.broadcast %132 : vector<16x1xf32> to vector<16x32xf32>
    %134 = arith.mulf %129, %133 : vector<16x32xf32>
    %135 = vector.broadcast %114 : vector<1x32xf32> to vector<16x32xf32>
    %136 = arith.mulf %134, %135 : vector<16x32xf32>
    %137 = vector.broadcast %115 : vector<1x32xf32> to vector<16x32xf32>
    %138 = arith.addf %136, %137 : vector<16x32xf32>
    %cst_52 = arith.constant 0.000000e+00 : f32
    %139 = vector.broadcast %cst_52 : f32 to vector<16x32xf32>
    %140 = tpu.concatenate %138, %21, %37, %53, %69, %139 in 1 : vector<16x32xf32>, vector<16x16xf32>, vector<16x16xf32>, vector<16x16xf32>, vector<16x16xf32>, vector<16x32xf32> -> vector<16x128xf32>
    %c0_53 = arith.constant 0 : index
    %c0_54 = arith.constant 0 : index
    %141 = vector.load %arg2[%c0_53, %c0_54] : memref<16x128xf32, #tpu.memory_space<vmem>>, vector<16x128xf32>
    tpu.vector_store %arg2[%c0_53, %c0_54], %140 {strides = array<i32>} : memref<16x128xf32, #tpu.memory_space<vmem>>, vector<16x128xf32>,
    return
  }
}

</mosaic_0001>

<bundles_post_ra>
// kernel: encoder_layer.1
= control target key start
LH: loop header
LB: loop body
LE: loop exit
PB: predicated region body
PF: predicated region fallthrough
CT: control target
= control target key end

     0   :  { %7 = vsyncpa [#allocation3], 0  ;;  %s1434_s0 = inlined_call_operand.hbm [shape: f32[16,32], index: 0, kind: input, shape index: {}]   ;;  %s1435_s1 = inlined_call_operand.hbm [shape: f32[104,128], index: 1, kind: input, shape index: {}]   ;;  %s1436_s2 = inlined_call_operand.vmem [shape: f32[16,128], index: 2, kind: output, shape index: {}]  }
   0x1   :  { %s13_s11 = sshll.u32 %s1434_s0, 4  ;;  %s14_s11 = int_to_ptr.hbm [resolvable:$true] %s13_s11 }
   0x2   :  { %8 = vsyncpa [#allocation5], 0  ;;  %s1106_s12 = smov [#allocation2]   ;;  %s26_s16 = sshll.u32 %s1435_s1, 4  ;;  %s27_s16 = int_to_ptr.hbm [resolvable:$true] %s26_s16 }
   0x3   :  { %s15_s13 = sshll.u32 %s1106_s12, 4  ;;  %s1107_s17 = smov 128   ;;  %s16_s13 = int_to_ptr.vmem [resolvable:$true] %s15_s13 }
   0x4   :  { %s1108_s18 = smov 8   ;;  %s1109_s19 = smov [#allocation4]  }
   0x5   :  { %21 = dma.hbm_to_vmem [thread:$0]  %s14_s11, 256, %s16_s13, [#allocation3], %s1107_s17, %s1107_s17, %s1108_s18  }
   0x6   :  { %s28_s20 = sshll.u32 %s1109_s19, 4  ;;  %s29_s20 = int_to_ptr.vmem [resolvable:$true] %s28_s20 }
   0x7   :  { %34 = dma.hbm_to_vmem [thread:$0]  %s27_s16, 1664, %s29_s20, [#allocation5], %s1107_s17, %s1107_s17, %s1108_s18  }
   0x8   :  { %1102 = dma.done.wait [#allocation3], 256  }
   0x9   :  { %1103 = vsyncadd [#allocation3], 4294967040 }
   0xa   :  { %1104 = dma.done.wait [#allocation5], 1664  }
   0xb   :  { %1105 = vsyncadd [#allocation5], 4294965632  ;;  %v1148_v0 = vld [vmem:[#allocation4 + $0x18] sm:$0xff]  ;;  %v1150_v1 = vld [vmem:[#allocation4 + $0x10] sm:$0xff]  ;;  %vm51_vm0 = vcmask 261120   ;;  %s1110_s0 = smov 120  }
   0xc   :  { %70 = vmatpush.msra.mxu0 %v1148_v0  ;;  %v989_v2 = vpack.i.bf16 %v1150_v1, %v1148_v0  ;;  %v1155_v3 = vld [vmem:[#allocation4 + $0x8] sm:$0xff]  ;;  %v1157_v4 = vld [vmem:[#allocation4] sm:$0xff]  ;;  %v1163_v6 = vld [vmem:[#allocation2] sm:$0xff]  ;;  %s1111_s1 = smov 88   ;;  %s1112_s21 = smov 96   ;;  %vm97_vm1 = vcmask 64512  }
   0xd   :  { %v994_v5 = vpack.i.bf16 %v1157_v4, %v1155_v3  ;;  %v1168_v7 = vld [vmem:[#allocation2 + $0x8] sm:$0xff]  ;;  %v1172_v8 = vld [vmem:[#allocation4 + $0x60] ss:$0 sm:$0xff]  ;;  %s1113_s22 = smov 104   ;;  %s1114_s23 = smov 72   ;;  %v1198_v13 = vld [vmem:[#allocation4 + $0x28] sm:$0xff] }
   0xe   :  { %71 = vmatpush.msra.mxu0 %v1150_v1  ;;  %s1115_s24 = smov 80   ;;  %s1116_s25 = smov 112   ;;  %v1206_v19 = vld [vmem:[#allocation4 + $0x20] sm:$0xff]  ;;  %vm129_vm2 = vcmask 130048  }
   0xf   :  { %s1117_s26 = smov 32   ;;  %s1118_s27 = smov 56  }
  0x10   :  { %72 = vmatpush.msra.mxu0 %v1155_v3  ;;  %s1119_s28 = smov 64   ;;  %s1120_s29 = smov 48  }
  0x11   :  { %s1121_s30 = smov 40   ;;  %s1122_s3 = smov 16  }
  0x12   :  { %73 = vmatpush.msra.mxu0 %v1157_v4  ;;  %s1123_s4 = smov 24  }
  0x13   :  { %918 = vmatmul.msk.f32.vlgmr.msra.gmra.mxu0 %vm51_vm0, %v1163_v6 }
  0x1b   :  { %919 = vmatmul.msk.f32.gmra.mxu0 %vm51_vm0, %v1168_v7 }
  0x90   :  { %v75_v9 = vpop.f32.mrf.mxu0 }
  0x91   :  { %v1175_v10 = vadd.f32 %v1172_v8, %v75_v9 }
  0x93   :  { %213 = vrot.lane.b32.xlu2 %v1175_v10, %s1110_s0 }
  0x98   :  { %v78_v11 = vpop.f32.mrf.mxu0 }
  0x99   :  { %v1179_v12 = vadd.f32 %v1172_v8, %v78_v11 }
  0x9b   :  { %219 = vrot.lane.b32.xlu1 %v1179_v12, %s1111_s1  ;;  %87 = vrot.lane.b32.xlu0 %v1179_v12, %s1112_s21  ;;  %v1237_v55 = vpack.i.bf16 %v1175_v10, %v1179_v12 }
  0x9c   :  { %215 = vrot.lane.b32.xlu2 %v1179_v12, %s1110_s0 }
  0xa3   :  { %217 = vrot.lane.b32.xlu1 %v1175_v10, %s1111_s1  ;;  %85 = vrot.lane.b32.xlu0 %v1175_v10, %s1112_s21 }
  0xa4   :  { %457 = vrot.lane.b32.xlu2 %v1175_v10, %s1113_s22 }
  0xab   :  { %461 = vrot.lane.b32.xlu1 %v1175_v10, %s1114_s23  ;;  %463 = vrot.lane.b32.xlu0 %v1179_v12, %s1114_s23 }
  0xac   :  { %459 = vrot.lane.b32.xlu2 %v1179_v12, %s1113_s22 }
  0xb3   :  { %339 = vrot.lane.b32.xlu1 %v1175_v10, %s1115_s24  ;;  %341 = vrot.lane.b32.xlu0 %v1179_v12, %s1115_s24 }
  0xb4   :  { %91 = vrot.lane.b32.xlu2 %v1206_v19, %s1117_s26 }
  0xbb   :  { %337 = vrot.lane.b32.xlu1 %v1179_v12, %s1116_s25  ;;  %335 = vrot.lane.b32.xlu0 %v1175_v10, %s1116_s25 }
  0xc3   :  { %93 = vrot.lane.b32.xlu0 %v1198_v13, %s1117_s26 }
  0xed   :  { %v214_v16 = vpop.permute.xlu2 %213 }
  0xf6   :  { %v216_v20 = vpop.permute.xlu2 %215 }
  0xfe   :  { %v458_v24 = vpop.permute.xlu2 %457 }
 0x106   :  { %v460_v27 = vpop.permute.xlu2 %459 }
 0x10d   :  { %v220_v14 = vpop.permute.xlu1 %219  ;;  %v88_v15 = vpop.permute.xlu0 %87 }
 0x10e   :  { %920 = vmatpush.xpose.msk.msra.mxu1 %vm97_vm1, %v88_v15  ;;  %926 = vmatpush.xpose.msk.msra.mxu3 %vm97_vm1, %v220_v14  ;;  %v92_v29 = vpop.permute.xlu2 %91 }
 0x115   :  { %v218_v17 = vpop.permute.xlu1 %217  ;;  %v86_v18 = vpop.permute.xlu0 %85 }
 0x116   :  { %921 = vmatpush.xpose.msk.msra.mxu1 %vm97_vm1, %v86_v18  ;;  %927 = vmatpush.xpose.msk.msra.mxu3 %vm97_vm1, %v218_v17 }
 0x119   :  { %922 = vmatmul.msk.f32.vlgmr.msra.gmra.mxu1 %vm97_vm1, %v1175_v10  ;;  %928 = vmatmul.msk.f32.vlgmr.msra.gmra.mxu3 %vm97_vm1, %v214_v16 }
 0x11d   :  { %v464_v21 = vpop.permute.xlu0 %463  ;;  %v462_v22 = vpop.permute.xlu1 %461 }
 0x11e   :  { %938 = vmatpush.xpose.msk.msrb.mxu3 %vm97_vm1, %v464_v21 }
 0x121   :  { %923 = vmatmul.msk.f32.gmra.mxu1 %vm97_vm1, %v1179_v12  ;;  %929 = vmatmul.msk.f32.gmra.mxu3 %vm97_vm1, %v216_v20 }
 0x122   :  { %939 = vmatpush.xpose.msk.msrb.mxu3 %vm97_vm1, %v462_v22 }
 0x125   :  { %v342_v23 = vpop.permute.xlu0 %341  ;;  %v340_v25 = vpop.permute.xlu1 %339 }
 0x126   :  { %932 = vmatpush.xpose.msk.msrb.mxu0 %vm97_vm1, %v342_v23 }
 0x129   :  { %940 = vmatmul.msk.f32.vlgmr.msrb.gmra.mxu3 %vm97_vm1, %v458_v24 }
 0x12a   :  { %933 = vmatpush.xpose.msk.msrb.mxu0 %vm97_vm1, %v340_v25 }
 0x12d   :  { %v336_v26 = vpop.permute.xlu0 %335  ;;  %v338_v28 = vpop.permute.xlu1 %337 }
 0x12e   :  { %934 = vmatmul.msk.f32.vlgmr.msrb.gmra.mxu0 %vm97_vm1, %v336_v26 }
 0x131   :  { %941 = vmatmul.msk.f32.gmra.mxu3 %vm97_vm1, %v460_v27 }
 0x135   :  { %v94_v34 = vpop.permute.xlu0 %93 }
 0x136   :  { %935 = vmatmul.msk.f32.gmra.mxu0 %vm97_vm1, %v338_v28 }
 0x196   :  { %v123_v30 = vpop.f32.mrf.mxu1 }
 0x197   :  { %v124_v31 = vadd.f32 %v123_v30, %v92_v29 }
 0x199   :  { %v130_v32 = vsel %vm129_vm2, %v124_v31, -inf }
 0x19a   :  { %131 = vmax.xlane.f32.xlu1 %v130_v32 }
 0x19c   :  { %v246_v33 = vpop.f32.mrf.mxu3 }
 0x19d   :  { %v247_v35 = vadd.f32 %v246_v33, %v92_v29 }
 0x19e   :  { %v126_v36 = vpop.f32.mrf.mxu1 }
 0x19f   :  { %v252_v37 = vsel %vm129_vm2, %v247_v35, -inf  ;;  %v127_v38 = vadd.f32 %v126_v36, %v94_v34 }
 0x1a0   :  { %253 = vmax.xlane.f32.xlu0 %v252_v37 }
 0x1a1   :  { %v133_v39 = vsel %vm129_vm2, %v127_v38, -inf }
 0x1a2   :  { %134 = vmax.xlane.f32.xlu2 %v133_v39 }
 0x1a4   :  { %v249_v40 = vpop.f32.mrf.mxu3 }
 0x1a5   :  { %v250_v45 = vadd.f32 %v249_v40, %v94_v34 }
 0x1a7   :  { %v255_v51 = vsel %vm129_vm2, %v250_v45, -inf }
 0x1ab   :  { %v368_v41 = vpop.f32.mrf.mxu0 }
 0x1ac   :  { %v369_v42 = vadd.f32 %v368_v41, %v92_v29  ;;  %v490_v43 = vpop.f32.mrf.mxu3 }
 0x1ad   :  { %v491_v53 = vadd.f32 %v490_v43, %v92_v29 }
 0x1ae   :  { %v374_v44 = vsel %vm129_vm2, %v369_v42, -inf }
 0x1af   :  { %375 = vmax.xlane.f32.xlu2 %v374_v44  ;;  %v496_v54 = vsel %vm129_vm2, %v491_v53, -inf }
 0x1b3   :  { %v371_v46 = vpop.f32.mrf.mxu0 }
 0x1b4   :  { %v1228_v47 = vadd.f32 %v371_v46, %v94_v34  ;;  %v493_v48 = vpop.f32.mrf.mxu3 }
 0x1b5   :  { %v494_v49 = vadd.f32 %v493_v48, %v94_v34 }
 0x1b6   :  { %v377_v50 = vsel %vm129_vm2, %v1228_v47, -inf }
 0x1b7   :  { %378 = vmax.xlane.f32.xlu1 %v377_v50  ;;  %256 = vmax.xlane.f32.xlu2 %v255_v51  ;;  %v499_v52 = vsel %vm129_vm2, %v494_v49, -inf }
 0x1b8   :  { %500 = vmax.xlane.f32.xlu0 %v499_v52 }
 0x1bf   :  { %497 = vmax.xlane.f32.xlu1 %v496_v54 }
 0x1cc   :  { %975 = vrot.lane.b32.xlu0 %v1237_v55, %s1118_s27 }
 0x20d   :  { %v132_v56 = vpop.xlane.xlu1 %131 }
 0x20e   :  { %v136_v57 = vsub.f32 %v124_v31, %v132_v56 }
 0x210   :  { %v138_v58 = vmul.f32 1.442695, %v136_v57 }
 0x212   :  { %1012 = vpow2.f32 %v138_v58 }
 0x213   :  { %v254_v11 = vpop.xlane.xlu0 %253 }
 0x214   :  { %v258_v15 = vsub.f32 %v247_v35, %v254_v11 }
 0x215   :  { %v135_v59 = vpop.xlane.xlu2 %134 }
 0x216   :  { %v137_v60 = vsub.f32 %v127_v38, %v135_v59  ;;  %v260_v17 = vmul.f32 1.442695, %v258_v15 }
 0x218   :  { %v1240_v61 = vpop.eup %1012  ;;  %v140_v62 = vmul.f32 1.442695, %v137_v60 }
 0x219   :  { %v142_v63 = vsel %vm129_vm2, %v1240_v61, 0.0 }
 0x21a   :  { %1014 = vpow2.f32 %v140_v62  ;;  %143 = vadd.xlane.f32.xlu2 %v142_v63 }
 0x220   :  { %v1244_v9 = vpop.eup %1014 }
 0x221   :  { %v145_v10 = vsel %vm129_vm2, %v1244_v9, 0.0 }
 0x222   :  { %146 = vadd.xlane.f32.xlu0 %v145_v10  ;;  %v376_v12 = vpop.xlane.xlu2 %375 }
 0x223   :  { %v380_v14 = vsub.f32 %v369_v42, %v376_v12 }
 0x225   :  { %v382_v16 = vmul.f32 1.442695, %v380_v14 }
 0x227   :  { %1016 = vpow2.f32 %v382_v16 }
 0x228   :  { %1018 = vpow2.f32 %v260_v17 }
 0x22a   :  { %v379_v18 = vpop.xlane.xlu1 %378  ;;  %v257_v20 = vpop.xlane.xlu2 %256 }
 0x22b   :  { %v259_v21 = vsub.f32 %v250_v45, %v257_v20  ;;  %v501_v25 = vpop.xlane.xlu0 %500  ;;  %v381_v39 = vsub.f32 %v1228_v47, %v379_v18 }
 0x22c   :  { %v503_v29 = vsub.f32 %v494_v49, %v501_v25 }
 0x22d   :  { %v1248_v22 = vpop.eup %1016  ;;  %v262_v23 = vmul.f32 1.442695, %v259_v21  ;;  %v384_v40 = vmul.f32 1.442695, %v381_v39 }
 0x22e   :  { %v386_v24 = vsel %vm129_vm2, %v1248_v22, 0.0  ;;  %v1254_v27 = vpop.eup %1018  ;;  %v506_v34 = vmul.f32 1.442695, %v503_v29 }
 0x22f   :  { %387 = vadd.xlane.f32.xlu1 %v386_v24  ;;  %1020 = vpow2.f32 %v262_v23  ;;  %v264_v32 = vsel %vm129_vm2, %v1254_v27, 0.0 }
 0x232   :  { %v498_v26 = vpop.xlane.xlu1 %497  ;;  %970 = vrot.lane.b32.xlu2 %v1237_v55, %s1119_s28 }
 0x233   :  { %v502_v28 = vsub.f32 %v491_v53, %v498_v26 }
 0x235   :  { %v504_v30 = vmul.f32 1.442695, %v502_v28  ;;  %v1256_v31 = vpop.eup %1020 }
 0x236   :  { %v267_v33 = vsel %vm129_vm2, %v1256_v31, 0.0 }
 0x237   :  { %1022 = vpow2.f32 %v504_v30  ;;  %265 = vadd.xlane.f32.xlu1 %v264_v32  ;;  %268 = vadd.xlane.f32.xlu0 %v267_v33 }
 0x238   :  { %1024 = vpow2.f32 %v506_v34 }
 0x239   :  { %1026 = vpow2.f32 %v384_v40 }
 0x23d   :  { %v1262_v35 = vpop.eup %1022 }
 0x23e   :  { %v508_v36 = vsel %vm129_vm2, %v1262_v35, 0.0  ;;  %v1266_v37 = vpop.eup %1024  ;;  %v976_v43 = vpop.permute.xlu0 %975 }
 0x23f   :  { %509 = vadd.xlane.f32.xlu1 %v508_v36  ;;  %v511_v38 = vsel %vm129_vm2, %v1266_v37, 0.0  ;;  %v1277_v41 = vpop.eup %1026  ;;  %v977_v51 = vunpack.i.l.bf16 %v976_v43  ;;  %v978_v3 = vunpack.i.h.bf16 %v976_v43 }
 0x240   :  { %v389_v42 = vsel %vm129_vm2, %v1277_v41, 0.0 }
 0x247   :  { %512 = vadd.xlane.f32.xlu1 %v511_v38 }
 0x24b   :  { %985 = vrot.lane.b32.xlu0 %v1237_v55, %s1120_s29 }
 0x253   :  { %990 = vrot.lane.b32.xlu0 %v989_v2, %s1117_s26 }
 0x25b   :  { %390 = vadd.xlane.f32.xlu2 %v389_v42 }
 0x260   :  { %980 = vrot.lane.b32.xlu1 %v1237_v55, %s1121_s30 }
 0x268   :  { %995 = vrot.lane.b32.xlu1 %v994_v5, %s1117_s26 }
 0x28d   :  { %v144_v44 = vpop.xlane.xlu2 %143 }
 0x28e   :  { %1028 = vrcp.f32 %v144_v44  ;;  %v159_v48 = vand.u32 2147483648, %v144_v44  ;;  %v157_v52 = vand.u32 2147483647, %v144_v44  ;;  %vm153_vm4 = vweird.f32 %v144_v44 }
 0x290   :  { %v160_v53 = vor.u32 1.1754944e-38, %v159_v48  ;;  %vm158_vm6 = vcmp.eq.f32.partialorder %v157_v52, 8.507059e+37 }
 0x294   :  { %v1029_v45 = vpop.eup %1028 }
 0x295   :  { %v149_v0 = vmul.f32 %v1029_v45, %v144_v44  ;;  %v971_v1 = vpop.permute.xlu2 %970  ;;  %v147_v2 = vpop.xlane.xlu0 %146  ;;  %vm154_vm3 = vweird.f32 %v1029_v45 }
 0x296   :  { %1030 = vrcp.f32 %v147_v2  ;;  %v972_v46 = vunpack.i.l.bf16 %v971_v1  ;;  %v973_v49 = vunpack.i.h.bf16 %v971_v1  ;;  %vm155_vm5 = vmor %vm153_vm4, %vm154_vm3  ;;  %v173_v60 = vand.u32 2147483648, %v147_v2 }
 0x297   :  { %v150_v47 = vsub.f32 1.0, %v149_v0  ;;  %v171_v63 = vand.u32 2147483647, %v147_v2  ;;  %vm167_vm8 = vweird.f32 %v147_v2 }
 0x298   :  { %204 = vmatpush.msra.mxu2 %v972_v46  ;;  %v174_v11 = vor.u32 1.1754944e-38, %v173_v60 }
 0x299   :  { %v151_v50 = vmul.f32 %v1029_v45, %v150_v47  ;;  %vm172_vm10 = vcmp.eq.f32.partialorder %v171_v63, 8.507059e+37 }
 0x29a   :  { %205 = vmatpush.msra.mxu2 %v973_v49 }
 0x29b   :  { %v152_v4 = vadd.f32 %v1029_v45, %v151_v50 }
 0x29c   :  { %326 = vmatpush.msrb.mxu2 %v977_v51  ;;  %v1031_v5 = vpop.eup %1030 }
 0x29d   :  { %v163_v54 = vmul.f32 %v1031_v5, %v147_v2  ;;  %v156_v55 = vsel %vm155_vm5, %v1029_v45, %v152_v4  ;;  %vm168_vm7 = vweird.f32 %v1031_v5 }
 0x29e   :  { %327 = vmatpush.msrb.mxu2 %v978_v3  ;;  %v161_v56 = vsel %vm158_vm6, %v160_v53, %v156_v55  ;;  %vm169_vm9 = vmor %vm167_vm8, %vm168_vm7 }
 0x29f   :  { %v164_v57 = vsub.f32 1.0, %v163_v54  ;;  %v1287_v58 = vmul.f32 %v1240_v61, %v161_v56 }
 0x2a1   :  { %v165_v59 = vmul.f32 %v1031_v5, %v164_v57  ;;  %924 = vmatmul.msk.f32.vlgmr.msra.gmra.mxu2 %vm129_vm2, %v1287_v58 }
 0x2a2   :  { %v388_v62 = vpop.xlane.xlu1 %387 }
 0x2a3   :  { %1032 = vrcp.f32 %v388_v62  ;;  %v166_v10 = vadd.f32 %v1031_v5, %v165_v59  ;;  %vm397_vm14 = vweird.f32 %v388_v62  ;;  %v401_v39 = vand.u32 2147483647, %v388_v62 }
 0x2a4   :  { %v403_v40 = vand.u32 2147483648, %v388_v62 }
 0x2a5   :  { %v170_v12 = vsel %vm169_vm9, %v1031_v5, %v166_v10  ;;  %vm402_vm8 = vcmp.eq.f32.partialorder %v401_v39, 8.507059e+37 }
 0x2a6   :  { %v175_v14 = vsel %vm172_vm10, %v174_v11, %v170_v12  ;;  %v404_v50 = vor.u32 1.1754944e-38, %v403_v40 }
 0x2a7   :  { %v1292_v15 = vmul.f32 %v1244_v9, %v175_v14 }
 0x2a9   :  { %v1033_v61 = vpop.eup %1032  ;;  %925 = vmatmul.msk.f32.gmra.mxu2 %vm129_vm2, %v1292_v15 }
 0x2aa   :  { %v266_v16 = vpop.xlane.xlu1 %265  ;;  %v269_v17 = vpop.xlane.xlu0 %268  ;;  %v393_v18 = vmul.f32 %v1033_v61, %v388_v62  ;;  %vm398_vm12 = vweird.f32 %v1033_v61 }
 0x2ab   :  { %1034 = vrcp.f32 %v266_v16  ;;  %v281_v9 = vand.u32 2147483648, %v266_v16  ;;  %v279_v33 = vand.u32 2147483647, %v266_v16  ;;  %vm275_vm13 = vweird.f32 %v266_v16  ;;  %vm1299_vm5 = vmor %vm397_vm14, %vm398_vm12 }
 0x2ac   :  { %1036 = vrcp.f32 %v269_v17  ;;  %v394_v20 = vsub.f32 1.0, %v393_v18  ;;  %v295_v0 = vand.u32 2147483648, %v269_v17  ;;  %vm289_vm6 = vweird.f32 %v269_v17 }
 0x2ad   :  { %v282_v42 = vor.u32 1.1754944e-38, %v281_v9  ;;  %vm280_vm3 = vcmp.eq.f32.partialorder %v279_v33, 8.507059e+37  ;;  %v293_v48 = vand.u32 2147483647, %v269_v17 }
 0x2ae   :  { %v395_v28 = vmul.f32 %v1033_v61, %v394_v20  ;;  %v296_v3 = vor.u32 1.1754944e-38, %v295_v0 }
 0x2af   :  { %vm294_vm9 = vcmp.eq.f32.partialorder %v293_v48, 8.507059e+37 }
 0x2b0   :  { %v396_v36 = vadd.f32 %v1033_v61, %v395_v28 }
 0x2b1   :  { %v1035_v21 = vpop.eup %1034 }
 0x2b2   :  { %v1037_v23 = vpop.eup %1036  ;;  %v271_v24 = vmul.f32 %v1035_v21, %v266_v16  ;;  %v1296_v25 = vpop.xlane.xlu1 %509  ;;  %vm276_vm11 = vweird.f32 %v1035_v21  ;;  %v400_v47 = vsel %vm1299_vm5, %v1033_v61, %v396_v36 }
 0x2b3   :  { %v285_v26 = vmul.f32 %v1037_v23, %v269_v17  ;;  %1038 = vrcp.f32 %v1296_v25  ;;  %vm277_vm15 = vmor %vm275_vm13, %vm276_vm11  ;;  %vm290_vm4 = vweird.f32 %v1037_v23  ;;  %v405_v5 = vsel %vm402_vm8, %v404_v50, %v400_v47 }
 0x2b4   :  { %v272_v29 = vsub.f32 1.0, %v271_v24  ;;  %vm291_vm7 = vmor %vm289_vm6, %vm290_vm4  ;;  %v1315_v55 = vmul.f32 %v1248_v22, %v405_v5  ;;  %v525_v22 = vand.u32 2147483648, %v1296_v25  ;;  %vm519_vm11 = vweird.f32 %v1296_v25 }
 0x2b5   :  { %v286_v30 = vsub.f32 1.0, %v285_v26  ;;  %v523_v11 = vand.u32 2147483647, %v1296_v25 }
 0x2b6   :  { %v273_v32 = vmul.f32 %v1035_v21, %v272_v29  ;;  %v526_v61 = vor.u32 1.1754944e-38, %v525_v22 }
 0x2b7   :  { %v287_v34 = vmul.f32 %v1037_v23, %v286_v30  ;;  %vm524_vm13 = vcmp.eq.f32.partialorder %v523_v11, 8.507059e+37 }
 0x2b8   :  { %v274_v38 = vadd.f32 %v1035_v21, %v273_v32 }
 0x2b9   :  { %v288_v44 = vadd.f32 %v1037_v23, %v287_v34  ;;  %v1039_v49 = vpop.eup %1038 }
 0x2ba   :  { %v278_v43 = vsel %vm277_vm15, %v1035_v21, %v274_v38  ;;  %v1303_v2 = vpop.xlane.xlu1 %512  ;;  %vm520_vm10 = vweird.f32 %v1039_v49 }
 0x2bb   :  { %v283_v1 = vsel %vm280_vm3, %v282_v42, %v278_v43  ;;  %v292_v52 = vsel %vm291_vm7, %v1037_v23, %v288_v44  ;;  %1040 = vrcp.f32 %v1303_v2  ;;  %vm521_vm12 = vmor %vm519_vm11, %vm520_vm10  ;;  %v539_v23 = vand.u32 2147483648, %v1303_v2 }
 0x2bc   :  { %v1306_v46 = vmul.f32 %v1254_v27, %v283_v1  ;;  %v515_v27 = vmul.f32 %v1039_v49, %v1296_v25  ;;  %v297_v54 = vsel %vm294_vm9, %v296_v3, %v292_v52  ;;  %vm533_vm15 = vweird.f32 %v1303_v2 }
 0x2bd   :  { %v986_v51 = vpop.permute.xlu0 %985  ;;  %v1320_v57 = vmul.f32 %v1256_v31, %v297_v54  ;;  %v537_v28 = vand.u32 2147483647, %v1303_v2  ;;  %v540_v30 = vor.u32 1.1754944e-38, %v539_v23  ;;  %vm607_vm9 = vcmask 195584  }
 0x2be   :  { %930 = vmatmul.msk.f32.vlgmr.msrb.gmra.mxu2 %vm129_vm2, %v1306_v46  ;;  %v987_v4 = vunpack.i.l.bf16 %v986_v51  ;;  %v988_v53 = vunpack.i.h.bf16 %v986_v51  ;;  %v516_v56 = vsub.f32 1.0, %v515_v27 }
 0x2bf   :  { %vm538_vm4 = vcmp.eq.f32.partialorder %v537_v28, 8.507059e+37 }
 0x2c0   :  { %448 = vmatpush.msrb.mxu1 %v987_v4  ;;  %v517_v60 = vmul.f32 %v1039_v49, %v516_v56 }
 0x2c1   :  { %v1041_v59 = vpop.eup %1040 }
 0x2c2   :  { %449 = vmatpush.msrb.mxu1 %v988_v53  ;;  %v529_v62 = vmul.f32 %v1041_v59, %v1303_v2  ;;  %v518_v63 = vadd.f32 %v1039_v49, %v517_v60  ;;  %vm534_vm14 = vweird.f32 %v1041_v59 }
 0x2c3   :  { %936 = vmatmul.msk.f32.vlgmr.msrb.gmra.mxu1 %vm129_vm2, %v1315_v55  ;;  %vm535_vm3 = vmor %vm533_vm15, %vm534_vm14  ;;  %vm787_vm15 = vcmask 523264  }
 0x2c4   :  { %v530_v10 = vsub.f32 1.0, %v529_v62  ;;  %v522_v31 = vsel %vm521_vm12, %v1039_v49, %v518_v63 }
 0x2c5   :  { %v527_v17 = vsel %vm524_vm13, %v526_v61, %v522_v31  ;;  %v991_v1 = vpop.permute.xlu0 %990 }
 0x2c6   :  { %931 = vmatmul.msk.f32.gmra.mxu2 %vm129_vm2, %v1320_v57  ;;  %v531_v14 = vmul.f32 %v1041_v59, %v530_v10  ;;  %v1331_v26 = vmul.f32 %v1262_v35, %v527_v17  ;;  %v992_v2 = vunpack.i.l.bf16 %v991_v1 }
 0x2c8   :  { %v532_v20 = vadd.f32 %v1041_v59, %v531_v14  ;;  %648 = vmatpush.msra.mxu0 %v992_v2 }
 0x2ca   :  { %v536_v9 = vsel %vm535_vm3, %v1041_v59, %v532_v20  ;;  %v1124_v20 = vmov 32.0  }
 0x2cb   :  { %v541_v36 = vsel %vm538_vm4, %v540_v30, %v536_v9  ;;  %v724_v9 = vld [vmem:[#allocation4 + $0x30] sm:$0xff]  ;;  %v725_v30 = vld [vmem:[#allocation4 + $0x38] sm:$0xff] }
 0x2cc   :  { %v1337_v39 = vmul.f32 %v1266_v37, %v541_v36  ;;  %v993_v37 = vunpack.i.h.bf16 %v991_v1 }
 0x2ce   :  { %v391_v12 = vpop.xlane.xlu2 %390  ;;  %649 = vmatpush.msra.mxu0 %v993_v37 }
 0x2cf   :  { %1042 = vrcp.f32 %v391_v12  ;;  %v417_v32 = vand.u32 2147483648, %v391_v12  ;;  %v415_v34 = vand.u32 2147483647, %v391_v12  ;;  %vm411_vm6 = vweird.f32 %v391_v12 }
 0x2d0   :  { %1044 = vrcp.f32 %v1124_v20 }
 0x2d1   :  { %v418_v35 = vor.u32 1.1754944e-38, %v417_v32  ;;  %vm416_vm8 = vcmp.eq.f32.partialorder %v415_v34, 8.507059e+37 }
 0x2d2   :  { %v981_v16 = vpop.permute.xlu1 %980 }
 0x2d3   :  { %v982_v18 = vunpack.i.l.bf16 %v981_v16  ;;  %v983_v24 = vunpack.i.h.bf16 %v981_v16 }
 0x2d5   :  { %v1043_v21 = vpop.eup %1042  ;;  %570 = vmatpush.msra.mxu2 %v982_v18 }
 0x2d6   :  { %v407_v25 = vmul.f32 %v1043_v21, %v391_v12  ;;  %vm412_vm5 = vweird.f32 %v1043_v21 }
 0x2d7   :  { %571 = vmatpush.msra.mxu2 %v983_v24  ;;  %vm413_vm7 = vmor %vm411_vm6, %vm412_vm5 }
 0x2d8   :  { %v408_v29 = vsub.f32 1.0, %v407_v25  ;;  %942 = vmatmul.msk.f32.vlgmr.msra.gmra.mxu2 %vm129_vm2, %v1331_v26 }
 0x2da   :  { %v409_v33 = vmul.f32 %v1043_v21, %v408_v29  ;;  %v996_v51 = vpop.permute.xlu1 %995 }
 0x2db   :  { %v998_v52 = vunpack.i.h.bf16 %v996_v51  ;;  %v997_v3 = vunpack.i.l.bf16 %v996_v51 }
 0x2dc   :  { %v410_v38 = vadd.f32 %v1043_v21, %v409_v33  ;;  %v999_v33 = vpack.i.bf16 %v724_v9, %v725_v30 }
 0x2dd   :  { %650 = vmatpush.msra.mxu0 %v997_v3 }
 0x2de   :  { %v414_v40 = vsel %vm413_vm7, %v1043_v21, %v410_v38  ;;  %v1045_v21 = vpop.eup %1044  ;;  %vm899_vm7 = vcmask 392192  }
 0x2df   :  { %v419_v42 = vsel %vm416_vm8, %v418_v35, %v414_v40  ;;  %651 = vmatpush.msra.mxu0 %v998_v52  ;;  %v669_v23 = vmul.f32 32.0, %v1045_v21 }
 0x2e0   :  { %943 = vmatmul.msk.f32.gmra.mxu2 %vm129_vm2, %v1337_v39  ;;  %v1342_v43 = vmul.f32 %v1277_v41, %v419_v42 }
 0x2e1   :  { %v670_v24 = vsub.f32 1.0, %v669_v23 }
 0x2e2   :  { %937 = vmatmul.msk.f32.gmra.mxu1 %vm129_vm2, %v1342_v43 }
 0x2e3   :  { %v671_v25 = vmul.f32 %v1045_v21, %v670_v24 }
 0x2e5   :  { %v672_v28 = vadd.f32 %v1045_v21, %v671_v25 }
 0x324   :  { %v207_v44 = vpop.f32.mrf.mxu2 }
 0x32c   :  { %v210_v45 = vpop.f32.mrf.mxu2 }
 0x340   :  { %v451_v0 = vpop.f32.mrf.mxu1 }
 0x341   :  { %589 = vrot.lane.b32.xlu0 %v451_v0, %s1122_s3  ;;  %v329_v47 = vpop.f32.mrf.mxu2  ;;  %v1004_v0 = vpack.i.bf16 %v1206_v19, %v1198_v13 }
 0x349   :  { %581 = vrot.lane.b32.xlu0 %v329_v47, %s1108_s18  ;;  %v332_v48 = vpop.f32.mrf.mxu2 }
 0x351   :  { %583 = vrot.lane.b32.xlu0 %v332_v48, %s1108_s18 }
 0x359   :  { %627 = vrot.lane.b32.xlu0 %v1172_v8, %s1117_s26 }
 0x35b   :  { %v573_v41 = vpop.f32.mrf.mxu2 }
 0x35c   :  { %597 = vrot.lane.b32.xlu1 %v573_v41, %s1123_s4 }
 0x35f   :  { %v454_v49 = vpop.f32.mrf.mxu1 }
 0x360   :  { %591 = vrot.lane.b32.xlu2 %v454_v49, %s1122_s3 }
 0x363   :  { %v576_v50 = vpop.f32.mrf.mxu2 }
 0x364   :  { %599 = vrot.lane.b32.xlu1 %v576_v50, %s1123_s4 }
 0x3b3   :  { %v590_v4 = vpop.permute.xlu0 %589 }
 0x3ba   :  { %v592_v60 = vpop.permute.xlu2 %591 }
 0x3bb   :  { %v582_v5 = vpop.permute.xlu0 %581 }
 0x3bc   :  { %v603_v27 = vsel %vm97_vm1, %v207_v44, %v582_v5  ;;  %v782_v5 = vld [vmem:[#allocation4 + $0x58] sm:$0xff] }
 0x3bd   :  { %v605_v53 = vsel %vm129_vm2, %v603_v27, %v590_v4  ;;  %802 = vmatpush.msra.mxu3 %v782_v5  ;;  %v1011_v27 = vld [vmem:[#allocation4 + $0x61] ss:$0 sm:$0xff] }
 0x3c3   :  { %v584_v56 = vpop.permute.xlu0 %583 }
 0x3c4   :  { %v604_v59 = vsel %vm97_vm1, %v210_v45, %v584_v56  ;;  %vm673_vm1 = vweird.f32 %v1045_v21  ;;  %v1371_v45 = vld [vmem:[#allocation4 + $0x62] ss:$0 sm:$0xff] }
 0x3c5   :  { %v606_v63 = vsel %vm129_vm2, %v604_v59, %v592_v60  ;;  %v1360_v29 = vsel %vm673_vm1, %v1045_v21, %v672_v28  ;;  %v779_v56 = vld [vmem:[#allocation4 + $0x40] sm:$0xff] }
 0x3cb   :  { %v628_v22 = vpop.permute.xlu0 %627 }
 0x3ce   :  { %v598_v8 = vpop.permute.xlu1 %597 }
 0x3cf   :  { %v608_v54 = vsel %vm607_vm9, %v605_v53, %v598_v8  ;;  %v780_v8 = vld [vmem:[#allocation4 + $0x48] sm:$0xff] }
 0x3d0   :  { %944 = vmatmul.msk.f32.vlgmr.msra.gmra.mxu0 %vm51_vm0, %v608_v54 }
 0x3d6   :  { %v600_v62 = vpop.permute.xlu1 %599 }
 0x3d7   :  { %v609_v10 = vsel %vm607_vm9, %v606_v63, %v600_v62  ;;  %vm904_vm9 = vcmask 654336  }
 0x3d8   :  { %945 = vmatmul.msk.f32.gmra.mxu0 %vm51_vm0, %v609_v10 }
 0x44d   :  { %v653_v11 = vpop.f32.mrf.mxu0 }
 0x44e   :  { %v654_v12 = vadd.f32 %v653_v11, %v628_v22 }
 0x450   :  { %v660_v31 = vadd.f32 %v654_v12, %v1163_v6 }
 0x452   :  { %v662_v14 = vsel %vm51_vm0, %v660_v31, 0.0 }
 0x453   :  { %663 = vadd.xlane.f32.xlu1 %v662_v14 }
 0x455   :  { %v656_v61 = vpop.f32.mrf.mxu0 }
 0x456   :  { %v657_v16 = vadd.f32 %v656_v61, %v628_v22 }
 0x458   :  { %v661_v17 = vadd.f32 %v657_v16, %v1168_v7 }
 0x45a   :  { %v665_v18 = vsel %vm51_vm0, %v661_v17, 0.0 }
 0x45b   :  { %666 = vadd.xlane.f32.xlu0 %v665_v18 }
 0x46f   :  { %1000 = vrot.lane.b32.xlu0 %v999_v33, %s1112_s21 }
 0x477   :  { %784 = vrot.lane.b32.xlu0 %v1011_v27, %s1119_s28 }
 0x4c6   :  { %v664_v6 = vpop.xlane.xlu1 %663 }
 0x4c7   :  { %v675_v32 = vmul.f32 %v1360_v29, %v664_v6 }
 0x4c9   :  { %v677_v7 = vsub.f32 %v660_v31, %v675_v32 }
 0x4cb   :  { %v679_v34 = vmul.f32 %v677_v7, %v677_v7 }
 0x4cd   :  { %v681_v36 = vsel %vm51_vm0, %v679_v34, 0.0 }
 0x4ce   :  { %v667_v38 = vpop.xlane.xlu0 %666  ;;  %682 = vadd.xlane.f32.xlu2 %v681_v36 }
 0x4cf   :  { %v676_v35 = vmul.f32 %v1360_v29, %v667_v38 }
 0x4d1   :  { %v1366_v40 = vsub.f32 %v661_v17, %v676_v35 }
 0x4d3   :  { %v680_v42 = vmul.f32 %v1366_v40, %v1366_v40 }
 0x4d5   :  { %v684_v44 = vsel %vm51_vm0, %v680_v42, 0.0 }
 0x4d6   :  { %685 = vadd.xlane.f32.xlu1 %v684_v44 }
 0x4e1   :  { %v1001_v1 = vpop.permute.xlu0 %1000 }
 0x4e2   :  { %v1002_v37 = vunpack.i.l.bf16 %v1001_v1  ;;  %v1003_v2 = vunpack.i.h.bf16 %v1001_v1 }
 0x4e4   :  { %762 = vmatpush.msra.mxu1 %v1002_v37 }
 0x4e6   :  { %717 = vrot.lane.b32.xlu2 %v1371_v45, %s1112_s21  ;;  %763 = vmatpush.msra.mxu1 %v1003_v2 }
 0x4e9   :  { %v785_v32 = vpop.permute.xlu0 %784 }
 0x4ee   :  { %868 = vrot.lane.b32.xlu2 %v1371_v45, %s1117_s26 }
 0x4ef   :  { %1005 = vrot.lane.b32.xlu1 %v1004_v0, %s1112_s21 }
 0x4f6   :  { %881 = vrot.lane.b32.xlu2 %v1320_v57, %s1120_s29  ;;  %v781_v57 = vld [vmem:[#allocation4 + $0x50] sm:$0xff] }
 0x4f7   :  { %803 = vmatpush.msra.mxu3 %v781_v57 }
 0x4f9   :  { %804 = vmatpush.msra.mxu3 %v780_v8 }
 0x4fb   :  { %805 = vmatpush.msra.mxu3 %v779_v56 }
 0x4fd   :  { %806 = vmatpush.msra.mxu3 %v725_v30 }
 0x4ff   :  { %807 = vmatpush.msra.mxu3 %v724_v9 }
 0x501   :  { %808 = vmatpush.msra.mxu3 %v1198_v13 }
 0x503   :  { %809 = vmatpush.msra.mxu3 %v1206_v19 }
 0x541   :  { %v683_v47 = vpop.xlane.xlu2 %682 }
 0x542   :  { %v687_v48 = vmul.f32 %v683_v47, %v1360_v29 }
 0x544   :  { %v689_v41 = vadd.f32 1e-05, %v687_v48 }
 0x546   :  { %1046 = vrsqrt.f32 %v689_v41  ;;  %vm697_vm10 = vweird.f32 %v689_v41 }
 0x549   :  { %v686_v49 = vpop.xlane.xlu1 %685  ;;  %v718_v18 = vpop.permute.xlu2 %717 }
 0x54a   :  { %v688_v50 = vmul.f32 %v686_v49, %v1360_v29 }
 0x54c   :  { %v1047_v51 = vpop.eup %1046  ;;  %v690_v52 = vadd.f32 1e-05, %v688_v50 }
 0x54d   :  { %v692_v3 = vmul.f32 %v1047_v51, %v689_v41  ;;  %vm698_vm2 = vweird.f32 %v1047_v51 }
 0x54e   :  { %1048 = vrsqrt.f32 %v690_v52  ;;  %vm699_vm11 = vmor %vm697_vm10, %vm698_vm2  ;;  %vm707_vm13 = vweird.f32 %v690_v52  ;;  %vm907_vm2 = vcmask 785408  }
 0x54f   :  { %v693_v4 = vmul.f32 %v1047_v51, %v692_v3 }
 0x551   :  { %v694_v53 = vmul.f32 0.5, %v693_v4 }
 0x553   :  { %v695_v54 = vsub.f32 1.5, %v694_v53 }
 0x554   :  { %v1049_v59 = vpop.eup %1048 }
 0x555   :  { %v702_v60 = vmul.f32 %v1049_v59, %v690_v52  ;;  %v696_v62 = vmul.f32 %v1047_v51, %v695_v54  ;;  %vm708_vm12 = vweird.f32 %v1049_v59 }
 0x556   :  { %vm709_vm14 = vmor %vm707_vm13, %vm708_vm12 }
 0x557   :  { %v703_v63 = vmul.f32 %v1049_v59, %v702_v60  ;;  %v700_v22 = vsel %vm699_vm11, %v1047_v51, %v696_v62 }
 0x558   :  { %v711_v12 = vmul.f32 %v700_v22, %v677_v7 }
 0x559   :  { %v704_v10 = vmul.f32 0.5, %v703_v63 }
 0x55a   :  { %v714_v14 = vmul.f32 %v1371_v45, %v711_v12 }
 0x55b   :  { %v705_v11 = vsub.f32 1.5, %v704_v10 }
 0x55c   :  { %v720_v21 = vadd.f32 %v718_v18, %v714_v14 }
 0x55d   :  { %v706_v31 = vmul.f32 %v1049_v59, %v705_v11 }
 0x55f   :  { %v710_v16 = vsel %vm709_vm14, %v1049_v59, %v706_v31 }
 0x560   :  { %v712_v23 = vmul.f32 %v710_v16, %v1366_v40 }
 0x561   :  { %v1006_v61 = vpop.permute.xlu1 %1005 }
 0x562   :  { %v1007_v17 = vunpack.i.l.bf16 %v1006_v61  ;;  %v1008_v20 = vunpack.i.h.bf16 %v1006_v61  ;;  %v715_v13 = vmul.f32 %v1371_v45, %v712_v23 }
 0x564   :  { %764 = vmatpush.msra.mxu1 %v1007_v17  ;;  %v721_v24 = vadd.f32 %v718_v18, %v715_v13 }
 0x566   :  { %765 = vmatpush.msra.mxu1 %v1008_v20 }
 0x567   :  { %946 = vmatmul.msk.f32.vlgmr.msra.gmra.mxu1 %vm51_vm0, %v720_v21 }
 0x56f   :  { %947 = vmatmul.msk.f32.gmra.mxu1 %vm51_vm0, %v721_v24 }
 0x5e4   :  { %v767_v19 = vpop.f32.mrf.mxu1 }
 0x5e5   :  { %v768_v25 = vadd.f32 %v1011_v27, %v767_v19 }
 0x5e7   :  { %v773_v28 = vmax.f32 %v768_v25, 0.0 }
 0x5e9   :  { %948 = vmatmul.msk.f32.vlgmr.msra.gmra.mxu3 %vm787_vm15, %v773_v28 }
 0x5ec   :  { %v770_v6 = vpop.f32.mrf.mxu1 }
 0x5ed   :  { %v771_v9 = vadd.f32 %v1011_v27, %v770_v6 }
 0x5ef   :  { %v774_v30 = vmax.f32 %v771_v9, 0.0 }
 0x5f1   :  { %949 = vmatmul.msk.f32.gmra.mxu3 %vm787_vm15, %v774_v30 }
 0x66c   :  { %v811_v33 = vpop.f32.mrf.mxu3 }
 0x66d   :  { %v812_v7 = vadd.f32 %v811_v33, %v785_v32 }
 0x66f   :  { %v817_v34 = vadd.f32 %v812_v7, %v720_v21 }
 0x671   :  { %v819_v36 = vsel %vm51_vm0, %v817_v34, 0.0 }
 0x672   :  { %820 = vadd.xlane.f32.xlu0 %v819_v36 }
 0x674   :  { %v814_v38 = vpop.f32.mrf.mxu3 }
 0x675   :  { %v815_v35 = vadd.f32 %v814_v38, %v785_v32 }
 0x677   :  { %v818_v40 = vadd.f32 %v815_v35, %v721_v24 }
 0x679   :  { %v822_v42 = vsel %vm51_vm0, %v818_v40, 0.0 }
 0x67a   :  { %823 = vadd.xlane.f32.xlu1 %v822_v42 }
 0x686   :  { %873 = vrot.lane.b32.xlu0 %v1287_v58, %s1117_s26 }
 0x68e   :  { %879 = vrot.lane.b32.xlu0 %v1306_v46, %s1120_s29 }
 0x693   :  { %863 = vrot.lane.b32.xlu1 %v1371_v45, %s1119_s28 }
 0x69b   :  { %875 = vrot.lane.b32.xlu1 %v1292_v15, %s1117_s26 }
 0x6a3   :  { %885 = vrot.lane.b32.xlu1 %v1315_v55, %s1119_s28  ;;  %v869_v55 = vpop.permute.xlu2 %868 }
 0x6ab   :  { %893 = vrot.lane.b32.xlu1 %v1337_v39, %s1115_s24  ;;  %v882_v48 = vpop.permute.xlu2 %881 }
 0x6e5   :  { %v821_v44 = vpop.xlane.xlu0 %820 }
 0x6e6   :  { %v825_v0 = vmul.f32 %v821_v44, %v1360_v29 }
 0x6e8   :  { %v827_v1 = vsub.f32 %v817_v34, %v825_v0 }
 0x6ea   :  { %v829_v58 = vmul.f32 %v827_v1, %v827_v1 }
 0x6ec   :  { %v831_v37 = vsel %vm51_vm0, %v829_v58, 0.0 }
 0x6ed   :  { %v824_v46 = vpop.xlane.xlu1 %823  ;;  %832 = vadd.xlane.f32.xlu2 %v831_v37 }
 0x6ee   :  { %v826_v45 = vmul.f32 %v824_v46, %v1360_v29 }
 0x6f0   :  { %v828_v2 = vsub.f32 %v818_v40, %v826_v45 }
 0x6f2   :  { %v830_v47 = vmul.f32 %v828_v2, %v828_v2 }
 0x6f4   :  { %v834_v15 = vsel %vm51_vm0, %v830_v47, 0.0 }
 0x6f5   :  { %835 = vadd.xlane.f32.xlu0 %v834_v15 }
 0x6f8   :  { %v874_v39 = vpop.permute.xlu0 %873 }
 0x700   :  { %v880_v41 = vpop.permute.xlu0 %879 }
 0x705   :  { %891 = vrot.lane.b32.xlu2 %v1331_v26, %s1115_s24  ;;  %v864_v3 = vpop.permute.xlu1 %863 }
 0x709   :  { %887 = vrot.lane.b32.xlu0 %v1342_v43, %s1119_s28 }
 0x70d   :  { %v876_v54 = vpop.permute.xlu1 %875 }
 0x715   :  { %v886_v31 = vpop.permute.xlu1 %885 }
 0x71d   :  { %v894_v6 = vpop.permute.xlu1 %893 }
 0x760   :  { %v833_v49 = vpop.xlane.xlu2 %832 }
 0x761   :  { %v837_v50 = vmul.f32 %v833_v49, %v1360_v29 }
 0x763   :  { %v839_v51 = vadd.f32 1e-05, %v837_v50 }
 0x765   :  { %1050 = vrsqrt.f32 %v839_v51  ;;  %vm847_vm4 = vweird.f32 %v839_v51 }
 0x768   :  { %v836_v52 = vpop.xlane.xlu0 %835  ;;  %v892_v17 = vpop.permute.xlu2 %891 }
 0x769   :  { %v838_v4 = vmul.f32 %v836_v52, %v1360_v29 }
 0x76b   :  { %v1051_v5 = vpop.eup %1050  ;;  %v840_v57 = vadd.f32 1e-05, %v838_v4 }
 0x76c   :  { %v842_v27 = vmul.f32 %v1051_v5, %v839_v51  ;;  %vm848_vm3 = vweird.f32 %v1051_v5 }
 0x76d   :  { %1052 = vrsqrt.f32 %v840_v57  ;;  %vm849_vm5 = vmor %vm847_vm4, %vm848_vm3  ;;  %vm857_vm8 = vweird.f32 %v840_v57 }
 0x76e   :  { %v843_v26 = vmul.f32 %v1051_v5, %v842_v27 }
 0x770   :  { %v844_v53 = vmul.f32 0.5, %v843_v26 }
 0x772   :  { %v845_v43 = vsub.f32 1.5, %v844_v53 }
 0x773   :  { %v1053_v8 = vpop.eup %1052 }
 0x774   :  { %v846_v56 = vmul.f32 %v1051_v5, %v845_v43  ;;  %v852_v59 = vmul.f32 %v1053_v8, %v840_v57  ;;  %vm858_vm6 = vweird.f32 %v1053_v8 }
 0x775   :  { %vm859_vm1 = vmor %vm857_vm8, %vm858_vm6 }
 0x776   :  { %v850_v60 = vsel %vm849_vm5, %v1051_v5, %v846_v56  ;;  %v853_v62 = vmul.f32 %v1053_v8, %v852_v59 }
 0x777   :  { %v861_v63 = vmul.f32 %v850_v60, %v827_v1 }
 0x778   :  { %v854_v10 = vmul.f32 0.5, %v853_v62 }
 0x779   :  { %v866_v22 = vmul.f32 %v864_v3, %v861_v63 }
 0x77a   :  { %v855_v29 = vsub.f32 1.5, %v854_v10 }
 0x77b   :  { %v871_v11 = vadd.f32 %v869_v55, %v866_v22  ;;  %v888_v28 = vpop.permute.xlu0 %887 }
 0x77c   :  { %v856_v12 = vmul.f32 %v1053_v8, %v855_v29 }
 0x77d   :  { %v897_v14 = vsel %vm51_vm0, %v871_v11, %v874_v39 }
 0x77e   :  { %v900_v61 = vsel %vm899_vm7, %v897_v14, %v880_v41  ;;  %v860_v16 = vsel %vm859_vm1, %v1053_v8, %v856_v12 }
 0x77f   :  { %v902_v18 = vsel %vm787_vm15, %v900_v61, %v886_v31  ;;  %v862_v20 = vmul.f32 %v860_v16, %v828_v2 }
 0x780   :  { %v905_v21 = vsel %vm904_vm9, %v902_v18, %v892_v17 }
 0x781   :  { %v908_v23 = vsel %vm907_vm2, %v905_v21, 0.0  ;;  %v867_v13 = vmul.f32 %v864_v3, %v862_v20 }
 0x782   :  { %910 = vst [vmem:[%s1436_s2] sm:$0xff] %v908_v23 }
 0x783   :  { %v872_v24 = vadd.f32 %v869_v55, %v867_v13 }
 0x785   :  { %v898_v19 = vsel %vm51_vm0, %v872_v24, %v876_v54 }
 0x786   :  { %v901_v25 = vsel %vm899_vm7, %v898_v19, %v882_v48 }
 0x787   :  { %v903_v9 = vsel %vm787_vm15, %v901_v25, %v888_v28 }
 0x788   :  { %v906_v30 = vsel %vm904_vm9, %v903_v9, %v894_v6 }
 0x789   :  { %v909_v32 = vsel %vm907_vm2, %v906_v30, 0.0 }
 0x78a   :  { %911 = vst [vmem:[%s1436_s2 + $0x8] sm:$0xff] %v909_v32 }
 0x78b   :  { %916 = vsyncpa [#allocation3], 1 }
 0x78c   :  { %917 = vsyncpa [#allocation5], 1 }

</bundles_post_ra>
